<compile_context>
chip_gen: v6e
topology: v6e:2x2x1
jax: 0.10.0
libtpu: 0.0.40
codegen_flags: <defaults>
</compile_context>

<pallas_src>
import functools

import jax
import jax.numpy as jnp
from jax import lax
from jax.experimental import pallas as pl
from jax.experimental.pallas import tpu as pltpu


_DEFAULT_TOKENS_PER_STEP = 256     # 256-512 amortizes the ~0.35us/step overhead
_GATHER_BUFFERS = 16               # outstanding row DMAs (power of two)
_SMEM_IDS_MAX_TOKENS = 16384       # above this, ids stay in HBM (SMEM pads to next_pow2(4N))


def _vmem_capacity_bytes():
    """Generation-aware VMEM capacity; conservative 64 MiB (v7x per-TC) fallback."""
    try:
        return int(pltpu.get_tpu_info().vmem_capacity_bytes)
    except Exception:
        return 64 * 1024 * 1024


# ---------------------------------------------------------------------------
# Dropout: counter-based hash PRNG (murmur3 fmix32) using only int32 VPU ops.
# Bit-identical to the uint32 reference: int32 mul/xor wrap the same way and
# the logical right-shifts are emulated with (arithmetic shift & mask).
# ---------------------------------------------------------------------------
def _dropout_keep_scale(seed_i32, rows_i32, cols_i32, drop_p):
    """(T, E) array of {0, 1/(1-p)} -- inverted-dropout multiplier."""
    h = (seed_i32
         ^ (rows_i32 * jnp.int32(-1640531527))      # 0x9E3779B9
         ^ (cols_i32 * jnp.int32(-862048943)))      # 0xCC9E2D51
    h = h ^ (jnp.right_shift(h, 16) & jnp.int32(0x0000FFFF))
    h = h * jnp.int32(-2048144789)                  # 0x85EBCA6B
    h = h ^ (jnp.right_shift(h, 13) & jnp.int32(0x0007FFFF))
    h = h * jnp.int32(-1028477387)                  # 0xC2B2AE35
    h = h ^ (jnp.right_shift(h, 16) & jnp.int32(0x0000FFFF))
    bits = h & jnp.int32(0x7FFFFFFF)                # uniform in [0, 2^31)
    thr = jnp.int32(min(int(round(float(drop_p) * 2147483648.0)), 2147483647))
    keep = bits >= thr                              # P(keep) = 1 - drop_p
    return jnp.where(keep, jnp.float32(1.0 / (1.0 - float(drop_p))),
                     jnp.float32(0.0))


def _dropout_block(block_f32, seed_smem, drop_p):
    """Apply inverted dropout to a (T, E) f32 block; mask keyed on global position."""
    T, E = block_f32.shape
    base = pl.program_id(0) * T
    rows = base + lax.broadcasted_iota(jnp.int32, (T, E), 0)
    cols = lax.broadcasted_iota(jnp.int32, (T, E), 1)
    return block_f32 * _dropout_keep_scale(seed_smem[0], rows, cols, drop_p)


# ---------------------------------------------------------------------------
# Small-vocab fast path: table resident in VMEM, one-hot MXU gather.
# ---------------------------------------------------------------------------
def _embed_vmem_kernel(seed_smem, ids_ref, table_ref, out_ref, *,
                       drop_p, training, hi_precision):
    T = out_ref.shape[0]
    V = table_ref.shape[0]
    ids = ids_ref[...]                                          # (T, 1) int32
    onehot = (ids == lax.broadcasted_iota(jnp.int32, (T, V), 1)
              ).astype(table_ref.dtype)                         # one-hot in table dtype
    block = jnp.dot(onehot, table_ref[...],
                    preferred_element_type=jnp.float32,
                    precision=lax.Precision.HIGHEST if hi_precision else None)
    if training and drop_p > 0.0:
        block = _dropout_block(block, seed_smem, drop_p)
    out_ref[...] = block.astype(out_ref.dtype)


# ---------------------------------------------------------------------------
# Large-vocab path: table stays in HBM; rows DMA'd straight into out_ref.
# ---------------------------------------------------------------------------
def _embed_hbm_kernel(seed_smem, ids_ref, table_hbm, out_ref, *scratch,
                      tokens, nbuf, drop_p, training, ids_prefetched):
    c = pl.program_id(0)

    if ids_prefetched:
        # All (padded) ids sit in SMEM via scalar prefetch.
        (sems,) = scratch
        ids_smem = ids_ref
        ids_base = c * tokens
    else:
        # ids live in HBM; pull this chunk's (T,) slice into SMEM first.
        ids_smem, ids_sem, sems = scratch
        cp = pltpu.make_async_copy(ids_ref.at[pl.ds(c * tokens, tokens)],
                                   ids_smem, ids_sem.at[0])
        cp.start()
        cp.wait()
        ids_base = 0

    def start_row(slot, row, idx):
        pltpu.make_async_copy(table_hbm.at[idx], out_ref.at[row],
                              sems.at[slot]).start()

    # Prime nbuf outstanding row fetches (statically unrolled).
    for i in range(nbuf):
        start_row(i, i, ids_smem[ids_base + i])

    # Ring: pre-read the next id, wait for row i, reissue on the freed slot.
    @pl.loop(0, tokens)
    def _(i):
        nxt = jnp.minimum(i + nbuf, tokens - 1)
        idx_next = ids_smem[ids_base + nxt]     # read BEFORE .wait() to keep
                                                # SMEM sst->sld forwarding alive
        slot = i & (nbuf - 1)
        # All rows have identical shape, so a descriptor built from row 0 has
        # the correct byte count for the wait.
        pltpu.make_async_copy(table_hbm.at[0], out_ref.at[i],
                              sems.at[slot]).wait()

        @pl.when(i + nbuf < tokens)
        def _():
            start_row(slot, i + nbuf, idx_next)

    # Eval mode: the gathered block already sits in out_ref -> pure-DMA body.
    if training and drop_p > 0.0:
        # TODO(synk): interleave dropout per nbuf-row slab with the gather ring
        # so the VPU work hides under the remaining row DMAs.
        block = _dropout_block(out_ref[...].astype(jnp.float32), seed_smem, drop_p)
        out_ref[...] = block.astype(out_ref.dtype)


# ---------------------------------------------------------------------------
# Wrapper
# ---------------------------------------------------------------------------
def embedding_layer_forward(ids, table, *, drop_p=0.25, training=False, seed=0,
                            tokens_per_step=_DEFAULT_TOKENS_PER_STEP,
                            force_hbm_gather=False):
    """Pallas equivalent of EmbeddingLayer.forward.

    ids   : (...,) integer token indices in [0, V)
    table : (V, E) embedding weights
    returns (..., E) in the table's dtype
    """
    orig_shape = tuple(ids.shape)
    V, E = table.shape
    N = int(ids.size)
    drop_p = max(0.0, float(drop_p))

    if training and drop_p >= 1.0:            # nn.Dropout(p=1.0): all zeros
        return jnp.zeros((*orig_shape, E), dtype=table.dtype)
    training = bool(training) and drop_p > 0.0

    # Chunk size: sublane multiple; shrink for tiny inputs so the "parallel"
    # chunk axis has >= 2 steps (keeps both v7x TensorCores busy).
    T = max(8, (int(tokens_per_step) // 8) * 8)
    if N <= T:
        T = max(8, ((-(-N // 2)) + 7) // 8 * 8)

    n_chunks = pl.cdiv(N, T)
    n_pad = n_chunks * T

    # Clamp out-of-range ids so every gather stays in bounds
    # (PyTorch nn.Embedding would raise instead).
    ids_flat = jnp.clip(ids.reshape(-1).astype(jnp.int32), 0, V - 1)
    if n_pad != N:
        ids_flat = jnp.pad(ids_flat, (0, n_pad - N))
    seed_arr = jnp.asarray([seed], dtype=jnp.int32)

    itemsize = jnp.dtype(table.dtype).itemsize
    table_bytes = V * E * itemsize
    vmem_budget = (_vmem_capacity_bytes() * 3) // 4

    # One-hot fast-path gating: dtype-aware vocab cap (f32 tables hit the slow
    # multi-pass MXU regime sooner) and the full working set must fit in VMEM.
    onehot_vocab_cap = 1024 if itemsize >= 4 else 2048
    # The default pipeline double-buffers the VMEM-resident table even with a
    # constant index_map.
    # TODO(synk): pipeline_mode=pl.Buffered(1) on the table spec would halve it.
    onehot_vmem = (2 * table_bytes             # resident table (x2 buffers)
                   + 2 * T * E * itemsize      # output blocks
                   + 2 * T * 4                 # id blocks
                   + T * V * itemsize          # one-hot intermediate
                   + 2 * T * E * 4)            # f32 dot result / dropout temps
    use_vmem_table = (not force_hbm_gather
                      and V <= onehot_vocab_cap
                      and onehot_vmem <= vmem_budget)

    if use_vmem_table:
        kernel = functools.partial(_embed_vmem_kernel, drop_p=drop_p,
                                   training=training,
                                   hi_precision=(itemsize >= 4))
        grid_spec = pltpu.PrefetchScalarGridSpec(
            num_scalar_prefetch=1,                        # seed -> SMEM
            grid=(n_chunks,),
            in_specs=[
                pl.BlockSpec((T, 1), lambda c, seed: (c, 0)),   # ids chunk
                pl.BlockSpec((V, E), lambda c, seed: (0, 0)),   # resident table
            ],
            out_specs=pl.BlockSpec((T, E), lambda c, seed: (c, 0)),
        )
        args = (seed_arr, ids_flat.reshape(n_pad, 1), table)
        needed = onehot_vmem
    else:
        nbuf = _GATHER_BUFFERS if T >= _GATHER_BUFFERS else 8
        ids_prefetched = n_pad <= _SMEM_IDS_MAX_TOKENS
        kernel = functools.partial(_embed_hbm_kernel, tokens=T, nbuf=nbuf,
                                   drop_p=drop_p, training=training,
                                   ids_prefetched=ids_prefetched)
        if ids_prefetched:
            grid_spec = pltpu.PrefetchScalarGridSpec(
                num_scalar_prefetch=2,                    # seed + flat ids -> SMEM
                grid=(n_chunks,),
                in_specs=[pl.BlockSpec(memory_space=pl.ANY)],      # table (HBM)
                out_specs=pl.BlockSpec((T, E), lambda c, seed, ids: (c, 0)),
                scratch_shapes=[pltpu.SemaphoreType.DMA((nbuf,))],
            )
        else:
            grid_spec = pltpu.PrefetchScalarGridSpec(
                num_scalar_prefetch=1,                    # seed -> SMEM
                grid=(n_chunks,),
                in_specs=[pl.BlockSpec(memory_space=pl.ANY),       # ids (HBM)
                          pl.BlockSpec(memory_space=pl.ANY)],      # table (HBM)
                out_specs=pl.BlockSpec((T, E), lambda c, seed: (c, 0)),
                scratch_shapes=[pltpu.SMEM((T,), jnp.int32),       # chunk ids
                                pltpu.SemaphoreType.DMA((1,)),     # ids slice DMA
                                pltpu.SemaphoreType.DMA((nbuf,))], # gather ring
            )
        args = (seed_arr, ids_flat, table)
        needed = 2 * T * E * itemsize + (2 * T * E * 4 if training else 0)

    vmem_limit = int(min(vmem_budget, max(32 * 1024 * 1024, needed + (8 << 20))))

    out_flat = pl.pallas_call(
        kernel,
        out_shape=jax.ShapeDtypeStruct((n_pad, E), table.dtype),
        grid_spec=grid_spec,
        compiler_params=pltpu.CompilerParams(
            dimension_semantics=("parallel",),   # chunks independent (2 TCs on v7x)
            vmem_limit_bytes=vmem_limit,
        ),
    )(*args)

    return out_flat[:N].reshape(*orig_shape, E)


if __name__ == "__main__":
    # Small shapes implied by the module: a (batch, seq) integer-id input.
    B, S = 2, 8
    VOCAB, EMBED = 32, 128
    DROP_EMBED = 0.25

    key = jax.random.PRNGKey(0)
    k_ids, k_w = jax.random.split(key)

    ids = jax.random.randint(k_ids, (B, S), 0, VOCAB, dtype=jnp.int32)

    # NOTE: the reference module's init_embedding_weights() zero-fills the
    # table; a random table is used here so the gather is actually exercised.
    weights = jax.random.normal(k_w, (VOCAB, EMBED), dtype=jnp.float32)
    ref = weights[ids]

    # 1) Eval mode, VMEM-resident-table one-hot fast path.
    out_eval = jax.block_until_ready(
        embedding_layer_forward(ids, weights, drop_p=DROP_EMBED, training=False))
    assert out_eval.shape == (B, S, EMBED)
    assert out_eval.dtype == weights.dtype
    assert jnp.allclose(out_eval, ref, atol=1e-6, rtol=1e-6)

    # 2) Eval mode, forced large-vocab path (HBM table, row DMAs straight into
    #    the output block -> pure-DMA body).
    out_hbm = jax.block_until_ready(
        embedding_layer_forward(ids, weights, drop_p=DROP_EMBED, training=False,
                                force_hbm_gather=True))
    assert jnp.allclose(out_hbm, ref, atol=1e-6, rtol=1e-6)

    # 3) Training mode: inverted dropout with p = 0.25 on both paths.
    scale = 1.0 / (1.0 - DROP_EMBED)
    outs = []
    for force in (False, True):
        out_tr = jax.block_until_ready(
            embedding_layer_forward(ids, weights, drop_p=DROP_EMBED,
                                    training=True, seed=123,
                                    force_hbm_gather=force))
        ok = (jnp.isclose(out_tr, 0.0, atol=1e-6)
              | jnp.isclose(out_tr, ref * scale, rtol=1e-5, atol=1e-5))
        assert bool(jnp.all(ok)), f"dropout values off (force_hbm={force})"
        keep_rate = float(jnp.mean((jnp.abs(out_tr) > 1e-6).astype(jnp.float32)))
        assert 0.55 < keep_rate < 0.92, f"unexpected keep rate {keep_rate}"
        outs.append(out_tr)
    # Same seed -> same mask regardless of the gather path taken.
    assert jnp.allclose(outs[0], outs[1], atol=1e-6, rtol=1e-6)

    print("KERNEL_OK")
</pallas_src>

<mosaic_0001>
module attributes {stable_mosaic.version = 11 : i64} {
  func.func @_embed_vmem_kernel(%arg0: i32, %arg1: memref<1xi32, #tpu.memory_space<smem>>, %arg2: memref<8x1xi32, #tpu.memory_space<vmem>>, %arg3: memref<32x128xf32, #tpu.memory_space<vmem>>, %arg4: memref<8x128xf32, #tpu.memory_space<vmem>>) attributes {dimension_semantics = [#tpu.dimension_semantics<parallel>], iteration_bounds = array<i64: 2>, scalar_prefetch = 1 : i64, scratch_operands = 0 : i64, tpu.core_type = #tpu.core_type<tc>, window_params = [{transform_indices = @transform_0, window_bounds = array<i64: 8, 1>}, {pipeline_mode = #tpu.pipeline_mode<synchronous>, transform_indices = @transform_1, window_bounds = array<i64: 32, 128>}, {transform_indices = @transform_2, window_bounds = array<i64: 8, 128>}]} {
    %c0 = arith.constant 0 : index
    %c0_0 = arith.constant 0 : index
    %0 = vector.load %arg2[%c0, %c0_0] : memref<8x1xi32, #tpu.memory_space<vmem>>, vector<8x1xi32>
    %1 = tpu.iota {dimensions = array<i32: 1>} : vector<8x32xi32>
    %2 = vector.broadcast %0 : vector<8x1xi32> to vector<8x32xi32>
    %3 = arith.cmpi eq, %2, %1 : vector<8x32xi32>
    %4 = arith.extui %3 : vector<8x32xi1> to vector<8x32xi32>
    %5 = arith.sitofp %4 : vector<8x32xi32> to vector<8x32xf32>
    %c0_1 = arith.constant 0 : index
    %c0_2 = arith.constant 0 : index
    %6 = vector.load %arg3[%c0_1, %c0_2] : memref<32x128xf32, #tpu.memory_space<vmem>>, vector<32x128xf32>
    %cst = arith.constant dense<0.000000e+00> : vector<8x128xf32>
    %7 = tpu.matmul %5, %6, %cst {dimension_numbers = #tpu.dot_dimension_numbers<[1], [0], [0], [1], [0, 0, 1, 1], [], []>, precision = #tpu.contract_precision<fp32>} : vector<8x32xf32>, vector<32x128xf32>, vector<8x128xf32> -> vector<8x128xf32>
    %c0_3 = arith.constant 0 : index
    %c0_4 = arith.constant 0 : index
    %8 = vector.load %arg4[%c0_3, %c0_4] : memref<8x128xf32, #tpu.memory_space<vmem>>, vector<8x128xf32>
    tpu.vector_store %arg4[%c0_3, %c0_4], %7 {strides = array<i32>} : memref<8x128xf32, #tpu.memory_space<vmem>>, vector<8x128xf32>,
    return
  }
  func.func @transform_0(%arg0: i32, %arg1: memref<1xi32, #tpu.memory_space<smem>>) -> (i32, i32) {
    %c0_i32 = arith.constant 0 : i32
    %c0_i32_0 = arith.constant 0 : i32
    return %arg0, %c0_i32 : i32, i32
  }
  func.func @transform_1(%arg0: i32, %arg1: memref<1xi32, #tpu.memory_space<smem>>) -> (i32, i32) {
    %c0_i32 = arith.constant 0 : i32
    %c0_i32_0 = arith.constant 0 : i32
    %c0_i32_1 = arith.constant 0 : i32
    return %c0_i32, %c0_i32_0 : i32, i32
  }
  func.func @transform_2(%arg0: i32, %arg1: memref<1xi32, #tpu.memory_space<smem>>) -> (i32, i32) {
    %c0_i32 = arith.constant 0 : i32
    %c0_i32_0 = arith.constant 0 : i32
    return %arg0, %c0_i32 : i32, i32
  }
}

</mosaic_0001>

<bundles_post_ra>
// kernel: tpu_custom_call.1
= control target key start
LH: loop header
LB: loop body
LE: loop exit
PB: predicated region body
PF: predicated region fallthrough
CT: control target
= control target key end

     0   :  { %9 = vsyncpa [#allocation5], 0  ;;  %s1231_s0 = inlined_call_operand.<no memory space> [shape: s32[1], index: 0, kind: input, shape index: {}]   ;;  %s1232_s1 = inlined_call_operand.vmem [shape: s32[16,1], index: 1, kind: input, shape index: {}]   ;;  %s1233_s2 = inlined_call_operand.hbm [shape: f32[32,128], index: 2, kind: input, shape index: {}]   ;;  %s1234_s3 = inlined_call_operand.hbm [shape: f32[16,128], index: 3, kind: output, shape index: {}]  }
   0x1   :  { %10 = vsyncpa [#allocation6], 0 }
   0x2   :  { %12 = vsyncpa [#allocation6 + $0x1], 0  ;;  %s1031_s12 = smov 0   ;;  %s1033_s13 = smov 0  }
   0x3   :  { %s1035_s14 = smov 0   ;;  %s1037_s15 = smov 0  }
   0x4 LB: > { %s1052_s0 = sadd.s32 4294967295, %s1002_s15   ;;  %s744_s16 = sadd.s32 4294967294, %s1002_s15   ;;  %s1002_s15 = sphi %s1037_s15, %s1242_s15   ;;  %s998_s14 = sphi %s1035_s14, %s1241_s14   ;;  %s994_s13 = sphi %s1033_s13, %s1240_s13   ;;  %s990_s12 = sphi %s1031_s12, %s1239_s12  }
   0x5   : > { %s1056_s17 = sadd.s32 1, %s1002_s15   ;;  %s72_s18 = sadd.s32 1, %s998_s14 }
   0x6   : > { %s69_s19 = ssub.s32 %s1002_s15, %s1056_s17  ;;  %p82_p0 = scmp.ne.s32.totalorder %s998_s14, %s994_s13 }
   0x7   : > { %p70_p1 = scmp.eq.s32.totalorder %s69_s19, 0  ;;  %p83_p2 = scmp.eq.s32.totalorder %s1052_s0, 1 }
   0x8   : > { %p88_p3 = scmp.ne.s32.totalorder %s994_s13, %s990_s12  ;;  %p89_p4 = scmp.eq.s32.totalorder %s744_s16, 1 }
   0x9   : > { %s1067_s20 = scalar_select %p70_p1, %s998_s14, %s72_s18  }
   0xa   : > { %p1069_p5 = por %p83_p2, %p82_p0  ;;  %p1073_p6 = por %p89_p4, %p88_p3 }
   0xb   : > { %p745_p7 = scmp.ge.s32.totalorder %s1002_s15, 1  ;;  %p96_p8 = scmp.lt.s32.totalorder %s1002_s15, 3 }
   0xc   : > { %s1236_s22 = scalar_select %p1073_p6, 1, 0 }
   0xd   : > { %p870_p9 = scmp.eq.s32.totalorder %s1052_s0, 0  ;;  %p1080_p10 = pnand %p745_p7, %p96_p8 }
   0xe   : > { %s1004_s24 = smov [#allocation4]  }
   0xf   : > { %s108_s25 = sshll.u32 %s1004_s24, 4  ;;  %p862_p11 = pneg %p1080_p10  ;;  %s109_s25 = int_to_ptr.vmem [resolvable:$true] %s108_s25 }
  0x10   : > { %s923_s26 = scalar_lea.vmem %s109_s25, 512  ;;  %p931_p3 = scmp.lt.s32.totalorder %s109_s25, %s109_s25 }
  0x11   : > { %p863_p12 = pnand %p870_p9, %p862_p11  ;;  %p924_p0 = scmp.ne.s32.totalorder %s109_s25, %s923_s26 }
  0x12   : > { %p932_p4 = scmp.lt.s32.totalorder %s923_s26, %s923_s26 }
  0x13   : > { %p914_p13 = pneg %p863_p12 }
  0x14   : > { %p933_p6 = por %p932_p4, %p931_p3 }
  0x15   : > { %p926_p1 = pnand %p924_p0, %p914_p13 }
  0x17   : > { %p927_p2 = pneg %p926_p1 }
  0x19   : > { %p934_p7 = pnand %p933_p6, %p927_p2 }
  0x1b   : > { %937 = shalt.err (!%p934_p7)
}
  0x1c   : > { %s1005_s27 = smov 128   ;;  %s1006_s28 = smov 8  }
  0x1d   : > { %865 = dma.hbm_to_vmem [thread:$0]  (!%p863_p12), %s1233_s2, 512, %s109_s25, [#allocation5], %s1005_s27, %s1005_s27, %s1006_s28  }
  0x1e   : > { %131 = sbr.rel (%p1080_p10) target bundleno = 405 (0x195), region = 28 }
  0x23   : > { %981 = dma.done.wait (%p870_p9), [#allocation5], 512  }
  0x24   : > { %983 = vsyncadd (%p870_p9), [#allocation5], 4294966784  ;;  %p152_p8 = scmp.lt.s32.totalorder %s1052_s0, 1  ;;  %v1007_v0 = vmov 0   ;;  %v1008_v1 = vmov 0.0   ;;  %vm1009_vm0 = vmmov 0   ;;  %v157_v27 = vlaneseq }
  0x25   : > { %911 = vset.pattern.permute.xlu0 %v1007_v0  ;;  %801 = vmatprep.subr.mxu1 %v1008_v1  ;;  %v168_v3 = vld [vmem:[#allocation4 + $0x18] sm:$0xff]  ;;  %v167_v4 = vld [vmem:[#allocation4 + $0x10] sm:$0xff]  ;;  %v166_v7 = vld [vmem:[#allocation4 + $0x8] sm:$0xff]  ;;  %vm169_vm1 = vcmask 261120   ;;  %s149_s9 = sand.u32 1, %s994_s13   ;;  %s757_s11 = sshll.u32 %s1052_s0, 7 }
  0x26   : > { %s153_s4 = scalar_select %p152_p8, %s1052_s0, 1  ;;  %790 = vmatprep.subr.mxu0 %v1008_v1  ;;  %809 = vmatprep.mubr.msk.f32.mxu1 %vm1009_vm0, %v1008_v1  ;;  %v198_v5 = vand.u32 4294901760, %v168_v3  ;;  %v1108_v6 = vand.u32 4294901760, %v167_v4  ;;  %v165_v8 = vld [vmem:[#allocation4] sm:$0xff]  ;;  %v1110_v9 = vand.u32 4294901760, %v166_v7  ;;  %v158_v28 = vand.u32 127, %v157_v27 }
  0x27   : > { %798 = vmatprep.mubr.msk.f32.mxu0 %vm1009_vm0, %v1008_v1  ;;  %v1112_v10 = vand.u32 4294901760, %v165_v8  ;;  %s750_s10 = sshll.u32 %s149_s9, 3  ;;  %s671_s24 = scalar_lea.hbm %s1234_s3, %s757_s11 }
  0x28   : > { %s751_s5 = sshll.u32 %s153_s4, 3  ;;  %v1114_v11 = vsub.f32 %v168_v3, %v198_v5  ;;  %v1117_v12 = vsub.f32 %v167_v4, %v1108_v6  ;;  %791 = vmatpush3.msra.mxu0 %v198_v5  ;;  %v1120_v13 = vsub.f32 %v166_v7, %v1110_v9  ;;  %s151_s16 = scalar_lea.vmem [#allocation7], %s750_s10 }
  0x29   : > { %s155_s8 = scalar_lea.vmem %s1232_s1, %s751_s5  ;;  %v1123_v14 = vsub.f32 %v165_v8, %v1112_v10  ;;  %792 = vmatprep.subr.mxu0 %v1008_v1  ;;  %s673_s18 = sshll.u32 %s151_s16, 4  ;;  %s674_s18 = int_to_ptr.vmem [resolvable:$true] %s673_s18 }
  0x2a   : > { %v156_v2 = vld [vmem:[%s155_s8] sm:$0xff]  ;;  %v279_v15 = vand.u32 4294901760, %v1114_v11  ;;  %v286_v16 = vand.u32 4294901760, %v1117_v12  ;;  %793 = vmatpush3.msra.mxu0 %v1108_v6  ;;  %v293_v17 = vand.u32 4294901760, %v1120_v13  ;;  %s660_s25 = scalar_lea.sflag [#allocation6], %s149_s9  ;;  %s938_s26 = scalar_lea.vmem %s674_s18, 128 }
  0x2b   : > { %160 = vperm.xlu0 %911, %v156_v2   ;;  %v300_v18 = vand.u32 4294901760, %v1123_v14  ;;  %794 = vmatprep.subr.mxu0 %v1008_v1  ;;  %p939_p6 = scmp.ne.s32.totalorder %s674_s18, %s938_s26  ;;  %s1010_s27 = smov [#allocation7]  }
  0x2c   : > { %v280_v19 = vsub.f32 %v1114_v11, %v279_v15  ;;  %v287_v20 = vsub.f32 %v1117_v12, %v286_v16  ;;  %795 = vmatpush3.msra.mxu0 %v1110_v9  ;;  %v294_v21 = vsub.f32 %v1120_v13, %v293_v17  ;;  %s942_s28 = sshll.u32 %s1010_s27, 4  ;;  %s943_s28 = int_to_ptr.vmem [resolvable:$false] %s942_s28 }
  0x2d   : > { %796 = vmatprep.subr.mxu0 %v1008_v1  ;;  %v301_v24 = vsub.f32 %v1123_v14, %v300_v18  ;;  %p940_p9 = pnand %p939_p6, %p1069_p5  ;;  %s944_s0 = scalar_lea.vmem %s943_s28, 256 }
  0x2e   : > { %v281_v22 = vand.u32 4294901760, %v280_v19  ;;  %v288_v23 = vand.u32 4294901760, %v287_v20  ;;  %797 = vmatpush3.msra.mxu0 %v1112_v10  ;;  %v295_v25 = vand.u32 4294901760, %v294_v21  ;;  %p945_p11 = scmp.lt.s32.totalorder %s674_s18, %s943_s28  ;;  %p946_p12 = scmp.lt.s32.totalorder %s944_s0, %s938_s26 }
  0x2f   : > { %812 = vmatprep.subr.mxu0 %v1008_v1  ;;  %v302_v26 = vand.u32 4294901760, %v301_v24  ;;  %p941_p10 = pneg %p940_p9 }
  0x30   : > { %802 = vmatpush3.msra.mxu1 %v281_v22  ;;  %p947_p13 = por %p946_p12, %p945_p11 }
  0x31   : > { %803 = vmatprep.subr.mxu1 %v1008_v1 }
  0x32   : > { %804 = vmatpush3.msra.mxu1 %v288_v23  ;;  %p948_p0 = pnand %p947_p13, %p941_p10 }
  0x33   : > { %805 = vmatprep.subr.mxu1 %v1008_v1 }
  0x34   : > { %806 = vmatpush3.msra.mxu1 %v295_v25 }
  0x35   : > { %807 = vmatprep.subr.mxu1 %v1008_v1 }
  0x36   : > { %808 = vmatpush3.msra.mxu1 %v302_v26 }
  0x37   : > { %823 = vmatprep.subr.mxu1 %v1008_v1 }
  0xa6   : > { %v161_v29 = vpop.permute.xlu0 %160 }
  0xa7   : > { %vm162_vm2 = vcmp.eq.s32.totalorder %v161_v29, %v158_v28 }
  0xa8   : > { %v752_v30 = vsel %vm162_vm2, 1.0, %v1008_v1 }
  0xa9   : > { %v171_v31 = vsel %vm169_vm1, %v752_v30, 0  ;;  %810 = vmatmul.mubr.msk.f32.vlgmr.msra.gmra.mxu1 %vm169_vm1, %v752_v30 }
  0xaa   : > { %v243_v32 = vsub.f32 %v171_v31, %v171_v31  ;;  %824 = vmatpush3.msra.mxu1 %v198_v5  ;;  %831 = vmatprep.mubr.msk.f32.mxu1 %vm1009_vm0, %v1008_v1 }
  0xab   : > { %825 = vmatprep.subr.mxu1 %v1008_v1 }
  0xac   : > { %826 = vmatpush3.msra.mxu1 %v1108_v6  ;;  %v244_v33 = vand.u32 4294901760, %v243_v32 }
  0xad   : > { %827 = vmatprep.subr.mxu1 %v1008_v1 }
  0xae   : > { %828 = vmatpush3.msra.mxu1 %v1110_v9  ;;  %v245_v34 = vsub.f32 %v243_v32, %v244_v33 }
  0xaf   : > { %829 = vmatprep.subr.mxu1 %v1008_v1 }
  0xb0   : > { %830 = vmatpush3.msra.mxu1 %v1112_v10  ;;  %v246_v35 = vand.u32 4294901760, %v245_v34 }
  0xb1   : > { %832 = vmatmul.mubr.f32.vlgmr.msra.gmra.mxu1 %v244_v33  ;;  %845 = vmatprep.subr.mxu1 %v1008_v1 }
  0xb2   : > { %846 = vmatpush3.msra.mxu1 %v198_v5  ;;  %799 = vmatmul.mubr.f32.vlgmr.msra.gmra.mxu0 %v246_v35 }
  0xb3   : > { %813 = vmatpush3.msra.mxu0 %v1114_v11  ;;  %847 = vmatprep.subr.mxu1 %v1008_v1 }
  0xb4   : > { %814 = vmatprep.subr.mxu0 %v1008_v1  ;;  %848 = vmatpush3.msra.mxu1 %v1108_v6 }
  0xb5   : > { %815 = vmatpush3.msra.mxu0 %v1117_v12  ;;  %849 = vmatprep.subr.mxu1 %v1008_v1 }
  0xb6   : > { %816 = vmatprep.subr.mxu0 %v1008_v1  ;;  %850 = vmatpush3.msra.mxu1 %v1110_v9 }
  0xb7   : > { %817 = vmatpush3.msra.mxu0 %v1120_v13  ;;  %851 = vmatprep.subr.mxu1 %v1008_v1 }
  0xb8   : > { %818 = vmatprep.subr.mxu0 %v1008_v1  ;;  %852 = vmatpush3.msra.mxu1 %v1112_v10 }
  0xb9   : > { %853 = vmatprep.mubr.msk.f32.mxu1 %vm1009_vm0, %v1008_v1  ;;  %819 = vmatpush3.msra.mxu0 %v1123_v14 }
  0xba   : > { %820 = vmatprep.mubr.msk.f32.mxu0 %vm1009_vm0, %v1008_v1  ;;  %854 = vmatmul.mubr.msk.f32.vlgmr.msra.gmra.mxu1 %vm169_vm1, %v752_v30 }
  0xbb   : > { %821 = vmatmul.mubr.f32.vlgmr.msra.gmra.mxu0 %v243_v32  ;;  %834 = vmatprep.subr.mxu0 %v1008_v1 }
  0xbc   : > { %835 = vmatpush3.msra.mxu0 %v279_v15  ;;  %842 = vmatprep.mubr.msk.f32.mxu0 %vm1009_vm0, %v1008_v1 }
  0xbd   : > { %836 = vmatprep.subr.mxu0 %v1008_v1 }
  0xbe   : > { %837 = vmatpush3.msra.mxu0 %v286_v16 }
  0xbf   : > { %838 = vmatprep.subr.mxu0 %v1008_v1 }
  0xc0   : > { %839 = vmatpush3.msra.mxu0 %v293_v17 }
  0xc1   : > { %840 = vmatprep.subr.mxu0 %v1008_v1 }
  0xc2   : > { %841 = vmatpush3.msra.mxu0 %v300_v18 }
  0xc3   : > { %843 = vmatmul.mubr.msk.f32.vlgmr.msra.gmra.mxu0 %vm169_vm1, %v752_v30 }
 0x169   : > { %v339_v36 = vpop.f32.mrf.mxu1 }
 0x16b   : > { %v811_v37 = vpop.f32.mrf.mxu1 }
 0x171   : > { %v496_v38 = vpop.f32.mrf.mxu1 }
 0x172   : > { %v248_v39 = vpop.f32.mrf.mxu0 }
 0x173   : > { %v833_v40 = vpop.f32.mrf.mxu1  ;;  %v340_v44 = vadd.f32 %v339_v36, %v248_v39 }
 0x174   : > { %v800_v41 = vpop.f32.mrf.mxu0 }
 0x17a   : > { %v654_v42 = vpop.f32.mrf.mxu1 }
 0x17b   : > { %v419_v43 = vpop.f32.mrf.mxu0 }
 0x17c   : > { %v855_v45 = vpop.f32.mrf.mxu1  ;;  %v420_v47 = vadd.f32 %v419_v43, %v340_v44 }
 0x17d   : > { %v822_v46 = vpop.f32.mrf.mxu0 }
 0x17e   : > { %v497_v48 = vadd.f32 %v496_v38, %v420_v47 }
 0x183   : > { %v579_v49 = vpop.f32.mrf.mxu0 }
 0x184   : > { %v580_v50 = vadd.f32 %v579_v49, %v497_v48 }
 0x185   : > { %v844_v51 = vpop.f32.mrf.mxu0 }
 0x186   : > { %v655_v52 = vadd.f32 %v654_v42, %v580_v50 }
 0x188   : > { %658 = vst [vmem:[%s151_s16] sm:$0xff] %v655_v52 }
 0x189   : > { %951 = shalt.err (!%p948_p0)
}
 0x18a   : > { %s952_s29 = scalar_lea.hbm %s671_s24, 128  ;;  %s956_s5 = scalar_lea.hbm %s1234_s3, 256 }
 0x18b   : > { %p953_p1 = scmp.ne.s32.totalorder %s671_s24, %s952_s29  ;;  %p957_p4 = scmp.lt.s32.totalorder %s671_s24, %s1234_s3 }
 0x18c   : > { %p958_p7 = scmp.lt.s32.totalorder %s956_s5, %s952_s29 }
 0x18d   : > { %p954_p2 = pnand %p953_p1, %p1069_p5 }
 0x18e   : > { %p959_p8 = por %p958_p7, %p957_p4 }
 0x18f   : > { %p955_p3 = pneg %p954_p2 }
 0x191   : > { %p960_p6 = pnand %p959_p8, %p955_p3 }
 0x193   : > { %963 = shalt.err (!%p960_p6)
}
 0x194   : > { %860 = dma.vmem_to_hbm [thread:$0]  (%p1069_p5), %s674_s18, 128, %s671_s24, %s660_s25  }
 0x195 PF: > { %p872_p9 = scmp.ge.s32.totalorder %s1002_s15, 2  ;;  %s685_s8 = sand.u32 1, %s990_s12  }
 0x196   : > { %p1238_p10 = scmp.ne.s32.totalorder %s1236_s22, 0  ;;  %s686_s9 = scalar_lea.sflag [#allocation6], %s685_s8 }
 0x198   : > { %p867_p11 = pnand %p872_p9, %p1238_p10 }
 0x19a   : > { %p868_p12 = pneg %p867_p11 }
 0x19c   : > { %985 = dma.done.wait (%p868_p12), %s686_s9, 128  }
 0x19d   : > { %987 = vsyncadd (%p868_p12), %s686_s9, 4294967168  ;;  %p15_p13 = scmp.ge.s32.totalorder %s1056_s17, 4   ;;  %s1239_s12 = smov %s994_s13 }
 0x19e   : > { %s1240_s13 = smov %s998_s14  ;;  %s1241_s14 = smov %s1067_s20 }
 0x19f   : > { %s1242_s15 = smov %s1056_s17  ;;  %17 = sbr.rel (!%p15_p13) target bundleno = 4 (0x4), region = 68 }
 0x1a4   :  { %691 = vsyncpa [#allocation5], 1 }
 0x1a5   :  { %693 = vsyncpa [#allocation5 + $0x1], 1 }
 0x1a6   :  { %694 = vsyncpa [#allocation6], 1 }
 0x1a7   :  { %696 = vsyncpa [#allocation6 + $0x1], 1 }

</bundles_post_ra>
